<compile_context>
chip_gen: v5e
topology: v5e:2x2
jax: 0.10.0
libtpu: 0.0.40
codegen_flags: <defaults>
</compile_context>

<pallas_src>
import jax
import jax.numpy as jnp
from jax import lax
from jax.experimental import pallas as pl
from jax.experimental.pallas import tpu as pltpu


# --------------------------------------------------------------------------
# Kernel bodies
# --------------------------------------------------------------------------
def _sobel_kernel_planes(x_ref, o_ref):
    """Plain layout. x_ref: (TB, H, W); o_ref: (TB, H-2, W-2)."""
    x = x_ref[...]
    top = x[:, :-2, :]
    mid = x[:, 1:-1, :]
    bot = x[:, 2:, :]
    # Separable Sobel: vertical pass on full-width rows (no lane shifts) ...
    s = top + 2.0 * mid + bot          # column smoothing  -> Sobel-x
    d = top - bot                      # column difference -> Sobel-y
    # ... then horizontal pass with only 3 lane-shifted reads.
    # TODO(synk): if a v7x bundle dump shows vld/XLU (not HBM) binding, rewrite
    # as a lax.fori_loop over 8-row sublane groups with pltpu.roll lane shifts.
    gx = s[:, :, 2:] - s[:, :, :-2]                          # Sobel-x
    gy = d[:, :, :-2] + 2.0 * d[:, :, 1:-1] + d[:, :, 2:]    # Sobel-y
    o_ref[...] = jnp.abs(gx) + jnp.abs(gy)


def _sobel_kernel_packed(x_ref, o_ref):
    """Channels-on-lanes layout. x_ref: (H, W, TN); o_ref: (H-2, W-2, TN)."""
    x = x_ref[...]
    top = x[:-2]       # leading-dim slices: cheap tile selection
    mid = x[1:-1]
    bot = x[2:]
    s = top + 2.0 * mid + bot          # vertical smoothing   -> Sobel-x
    d = top - bot                      # vertical difference  -> Sobel-y
    gx = s[:, 2:, :] - s[:, :-2, :]                          # Sobel-x
    gy = d[:, :-2, :] + 2.0 * d[:, 1:-1, :] + d[:, 2:, :]    # Sobel-y
    o_ref[...] = jnp.abs(gx) + jnp.abs(gy)


# --------------------------------------------------------------------------
# Sizing helpers
# --------------------------------------------------------------------------
def _padded_bytes(lead, rows, cols, itemsize):
    """VMEM footprint of a (lead, rows, cols) f32-style block after (8,128) tiling."""
    sub = -(-rows // 8) * 8
    lane = -(-cols // 128) * 128
    return lead * sub * lane * itemsize


def _vmem_plan():
    """Generation-aware (vmem_limit_bytes, target_block_bytes)."""
    cap = 128 * 1024 * 1024
    try:
        info = pltpu.get_tpu_info()
        cap = int(getattr(info, "vmem_capacity_bytes", cap) or cap)
    except Exception:
        pass
    # 128 MiB chips (v5e/v6e) -> 64 MiB scoped limit; 64 MiB chips (v7x) -> 48 MiB.
    limit = min(64 * 1024 * 1024, (cap * 3) // 4)
    target_block = max(1 * 1024 * 1024, limit // 8)   # double-buffers + temporaries headroom
    return limit, target_block


_MIN_GRID_STEPS = 8   # >= 4 steps per TensorCore on v7x for pipelined prefetch/writeback


def _choose_tb(nc, H, W, itemsize, target_block_bytes):
    """Plane-block size for the plain path. Returns 0 if one plane is too big."""
    plane_padded = _padded_bytes(1, H, W, itemsize)
    if plane_padded > target_block_bytes:
        return 0
    cap = max(1, target_block_bytes // plane_padded)
    desired_steps = min(_MIN_GRID_STEPS, nc)
    return max(1, min(cap, max(1, nc // desired_steps)))


def _choose_tn(nc, H, W, itemsize, target_block_bytes):
    """Lane-block size for the packed path. Returns 0 if packed path is unsuitable."""
    if nc > 128 and nc % 128 != 0:
        return 0                      # awkward lane extent; plain path handles it
    unit = nc if nc <= 128 else 128   # minimum legal lane block (128-divisible or full)
    if _padded_bytes(H, W, unit, itemsize) > target_block_bytes:
        return 0                      # plane too tall for one lane group; fall back
    if nc <= 128:
        return nc
    unit_bytes = _padded_bytes(H, W, 128, itemsize)
    k = max(1, target_block_bytes // unit_bytes)
    groups = nc // 128
    desired_steps = min(_MIN_GRID_STEPS, groups)
    k = min(k, max(1, groups // desired_steps))
    return 128 * k


# --------------------------------------------------------------------------
# pallas_call wrappers
# --------------------------------------------------------------------------
def _cost(nc, H, W, itemsize):
    out_elems = nc * (H - 2) * (W - 2)
    return pl.CostEstimate(
        flops=11 * out_elems,
        transcendentals=0,
        bytes_accessed=nc * H * W * itemsize + out_elems * itemsize,
    )


def _plain_pallas(x_flat, tb, vmem_limit_bytes):
    nc, H, W = x_flat.shape
    itemsize = jnp.dtype(x_flat.dtype).itemsize
    grid = pl.cdiv(nc, tb)   # masked partial last block is fine (planes independent)
    return pl.pallas_call(
        _sobel_kernel_planes,
        out_shape=jax.ShapeDtypeStruct((nc, H - 2, W - 2), x_flat.dtype),
        grid_spec=pltpu.PrefetchScalarGridSpec(
            num_scalar_prefetch=0,
            grid=(grid,),
            in_specs=[pl.BlockSpec((tb, H, W), lambda i: (i, 0, 0))],
            out_specs=pl.BlockSpec((tb, H - 2, W - 2), lambda i: (i, 0, 0)),
        ),
        compiler_params=pltpu.CompilerParams(
            dimension_semantics=("parallel",),
            vmem_limit_bytes=vmem_limit_bytes,
        ),
        cost_estimate=_cost(nc, H, W, itemsize),
    )(x_flat)


def _packed_pallas(x_t, tn, vmem_limit_bytes):
    H, W, nc = x_t.shape
    itemsize = jnp.dtype(x_t.dtype).itemsize
    grid = pl.cdiv(nc, tn)
    return pl.pallas_call(
        _sobel_kernel_packed,
        out_shape=jax.ShapeDtypeStruct((H - 2, W - 2, nc), x_t.dtype),
        grid_spec=pltpu.PrefetchScalarGridSpec(
            num_scalar_prefetch=0,
            grid=(grid,),
            in_specs=[pl.BlockSpec((H, W, tn), lambda i: (0, 0, i))],
            out_specs=pl.BlockSpec((H - 2, W - 2, tn), lambda i: (0, 0, i)),
        ),
        compiler_params=pltpu.CompilerParams(
            dimension_semantics=("parallel",),
            vmem_limit_bytes=vmem_limit_bytes,
        ),
        cost_estimate=_cost(nc, H, W, itemsize),
    )(x_t)


def gradient_sobel(x):
    """x: (N, C, H, W) float32 -> (N, C, H-2, W-2) float32."""
    N, C, H, W = x.shape
    assert H >= 3 and W >= 3, "3x3 VALID conv needs H, W >= 3"
    nc = N * C
    itemsize = jnp.dtype(x.dtype).itemsize
    vmem_limit, target_block = _vmem_plan()
    x_flat = x.reshape(nc, H, W)

    # Packed (lane-dense) path for narrow images: channels move to the lane axis.
    if W < 128 and nc >= W:
        tn = _choose_tn(nc, H, W, itemsize, target_block)
        if tn > 0:
            x_t = jnp.transpose(x_flat, (1, 2, 0))            # (H, W, NC)
            out_t = _packed_pallas(x_t, tn, vmem_limit)        # (H-2, W-2, NC)
            out_flat = jnp.transpose(out_t, (2, 0, 1))         # (NC, H-2, W-2)
            return out_flat.reshape(N, C, H - 2, W - 2)

    # Plain path: fused plane axis on the grid.
    tb = _choose_tb(nc, H, W, itemsize, target_block)
    if tb > 0:
        out_flat = _plain_pallas(x_flat, tb, vmem_limit)
    else:
        # Single plane exceeds the VMEM budget: wrapper-level H-chunking with a
        # 2-row halo so huge images still run (graceful degradation).
        # TODO(synk): move the halo into the kernel (pl.Element on H or a manual
        # pltpu.emit_pipeline) to avoid the extra HBM traffic of wrapper slices.
        lane_w = -(-W // 128) * 128
        rows_cap = max(10, target_block // (lane_w * itemsize))
        oh = max(8, rows_cap - 10)                 # output rows per chunk
        pieces = []
        h0 = 0
        while h0 < H - 2:
            rows = min(oh, H - 2 - h0)
            xc = lax.slice_in_dim(x_flat, h0, h0 + rows + 2, axis=1)
            tbc = max(1, _choose_tb(nc, rows + 2, W, itemsize, target_block))
            pieces.append(_plain_pallas(xc, tbc, vmem_limit))
            h0 += rows
        out_flat = jnp.concatenate(pieces, axis=1)
    return out_flat.reshape(N, C, H - 2, W - 2)


# --------------------------------------------------------------------------
# Pure-JAX reference (depthwise 3x3 convs, abs-sum) and self-test
# --------------------------------------------------------------------------
def _reference(x):
    N, C, H, W = x.shape
    k1 = jnp.array([[-1, 0, 1], [-2, 0, 2], [-1, 0, 1]], jnp.float32)
    k2 = jnp.array([[1, 2, 1], [0, 0, 0], [-1, -2, -1]], jnp.float32)
    w1 = jnp.tile(k1[None, None], (C, 1, 1, 1))
    w2 = jnp.tile(k2[None, None], (C, 1, 1, 1))
    dn = lax.conv_dimension_numbers(x.shape, w1.shape, ("NCHW", "OIHW", "NCHW"))
    c1 = lax.conv_general_dilated(x, w1, (1, 1), "VALID",
                                  dimension_numbers=dn, feature_group_count=C)
    c2 = lax.conv_general_dilated(x, w2, (1, 1), "VALID",
                                  dimension_numbers=dn, feature_group_count=C)
    return jnp.abs(c1) + jnp.abs(c2)


if __name__ == "__main__":
    # Primary shape matches the module (channels=64 depthwise conv); W=16 < 128
    # exercises the packed, lane-dense path (N*C = 128 lanes).
    key = jax.random.PRNGKey(0)
    N, C, H, W = 2, 64, 16, 16
    x = jax.random.normal(key, (N, C, H, W), dtype=jnp.float32)
    out = jax.block_until_ready(gradient_sobel(x))
    ref = _reference(x)
    assert out.shape == (N, C, H - 2, W - 2), out.shape
    assert jnp.allclose(out, ref, atol=1e-5, rtol=1e-5), "packed path mismatch"

    # Secondary check: wide-W input exercises the plain planes-on-grid path.
    x2 = jax.random.normal(jax.random.PRNGKey(1), (2, 4, 16, 256), jnp.float32)
    out2 = jax.block_until_ready(gradient_sobel(x2))
    ref2 = _reference(x2)
    assert out2.shape == (2, 4, 14, 254), out2.shape
    assert jnp.allclose(out2, ref2, atol=1e-5, rtol=1e-5), "plain path mismatch"

    print("KERNEL_OK")
</pallas_src>

<mosaic_0001>
module attributes {stable_mosaic.version = 11 : i64} {
  func.func @_sobel_kernel_packed(%arg0: i32, %arg1: memref<16x16x128xf32, #tpu.memory_space<vmem>>, %arg2: memref<14x14x128xf32, #tpu.memory_space<vmem>>) attributes {dimension_semantics = [#tpu.dimension_semantics<parallel>], iteration_bounds = array<i64: 1>, scalar_prefetch = 0 : i64, scratch_operands = 0 : i64, tpu.core_type = #tpu.core_type<tc>, window_params = [{transform_indices = @transform_0, window_bounds = array<i64: 16, 16, 128>}, {transform_indices = @transform_1, window_bounds = array<i64: 14, 14, 128>}]} {
    %c0 = arith.constant 0 : index
    %c0_0 = arith.constant 0 : index
    %c0_1 = arith.constant 0 : index
    %0 = vector.load %arg1[%c0, %c0_0, %c0_1] : memref<16x16x128xf32, #tpu.memory_space<vmem>>, vector<16x16x128xf32>
    %1 = vector.extract_strided_slice %0 {offsets = [0, 0, 0], sizes = [14, 16, 128], strides = [1, 1, 1]} : vector<16x16x128xf32> to vector<14x16x128xf32>
    %2 = vector.extract_strided_slice %0 {offsets = [1, 0, 0], sizes = [14, 16, 128], strides = [1, 1, 1]} : vector<16x16x128xf32> to vector<14x16x128xf32>
    %3 = vector.extract_strided_slice %0 {offsets = [2, 0, 0], sizes = [14, 16, 128], strides = [1, 1, 1]} : vector<16x16x128xf32> to vector<14x16x128xf32>
    %cst = arith.constant 2.000000e+00 : f32
    %4 = vector.broadcast %cst : f32 to vector<14x16x128xf32>
    %5 = arith.mulf %4, %2 : vector<14x16x128xf32>
    %6 = arith.addf %1, %5 : vector<14x16x128xf32>
    %7 = arith.addf %6, %3 : vector<14x16x128xf32>
    %8 = arith.subf %1, %3 : vector<14x16x128xf32>
    %9 = vector.extract_strided_slice %7 {offsets = [0, 2, 0], sizes = [14, 14, 128], strides = [1, 1, 1]} : vector<14x16x128xf32> to vector<14x14x128xf32>
    %10 = vector.extract_strided_slice %7 {offsets = [0, 0, 0], sizes = [14, 14, 128], strides = [1, 1, 1]} : vector<14x16x128xf32> to vector<14x14x128xf32>
    %11 = arith.subf %9, %10 : vector<14x14x128xf32>
    %12 = vector.extract_strided_slice %8 {offsets = [0, 0, 0], sizes = [14, 14, 128], strides = [1, 1, 1]} : vector<14x16x128xf32> to vector<14x14x128xf32>
    %13 = vector.extract_strided_slice %8 {offsets = [0, 1, 0], sizes = [14, 14, 128], strides = [1, 1, 1]} : vector<14x16x128xf32> to vector<14x14x128xf32>
    %cst_2 = arith.constant 2.000000e+00 : f32
    %14 = vector.broadcast %cst_2 : f32 to vector<14x14x128xf32>
    %15 = arith.mulf %14, %13 : vector<14x14x128xf32>
    %16 = arith.addf %12, %15 : vector<14x14x128xf32>
    %17 = vector.extract_strided_slice %8 {offsets = [0, 2, 0], sizes = [14, 14, 128], strides = [1, 1, 1]} : vector<14x16x128xf32> to vector<14x14x128xf32>
    %18 = arith.addf %16, %17 : vector<14x14x128xf32>
    %19 = math.absf %11 : vector<14x14x128xf32>
    %20 = math.absf %18 : vector<14x14x128xf32>
    %21 = arith.addf %19, %20 : vector<14x14x128xf32>
    %c0_3 = arith.constant 0 : index
    %c0_4 = arith.constant 0 : index
    %c0_5 = arith.constant 0 : index
    %22 = vector.load %arg2[%c0_3, %c0_4, %c0_5] : memref<14x14x128xf32, #tpu.memory_space<vmem>>, vector<14x14x128xf32>
    tpu.vector_store %arg2[%c0_3, %c0_4, %c0_5], %21 {strides = array<i32>} : memref<14x14x128xf32, #tpu.memory_space<vmem>>, vector<14x14x128xf32>,
    return
  }
  func.func @transform_0(%arg0: i32) -> (i32, i32, i32) {
    %c0_i32 = arith.constant 0 : i32
    %c0_i32_0 = arith.constant 0 : i32
    %c0_i32_1 = arith.constant 0 : i32
    return %c0_i32, %c0_i32_0, %arg0 : i32, i32, i32
  }
  func.func @transform_1(%arg0: i32) -> (i32, i32, i32) {
    %c0_i32 = arith.constant 0 : i32
    %c0_i32_0 = arith.constant 0 : i32
    %c0_i32_1 = arith.constant 0 : i32
    return %c0_i32, %c0_i32_0, %arg0 : i32, i32, i32
  }
}

</mosaic_0001>

<bundles_post_ra>
// kernel: tpu_custom_call.1
= control target key start
LH: loop header
LB: loop body
LE: loop exit
PB: predicated region body
PF: predicated region fallthrough
CT: control target
= control target key end

     0   :  { %6 = vsyncpa [#allocation3], 0  ;;  %s1113_s0 = inlined_call_operand.hbm [shape: f32[16,16,128], index: 0, kind: input, shape index: {}]   ;;  %s1114_s1 = inlined_call_operand.hbm [shape: f32[14,14,128], index: 1, kind: output, shape index: {}]  }
   0x1   :  { %7 = vsyncpa [#allocation4], 0  ;;  %s12_s8 = sshll.u32 %s1113_s0, 4  ;;  %s863_s9 = smov [#allocation2]   ;;  %s13_s8 = int_to_ptr.hbm [resolvable:$true] %s12_s8 }
   0x2   :  { %s14_s10 = sshll.u32 %s863_s9, 4  ;;  %s864_s11 = smov 128   ;;  %s15_s10 = int_to_ptr.vmem [resolvable:$true] %s14_s10 }
   0x3   :  { %s865_s12 = smov 8  }
   0x4   :  { %20 = dma.hbm_to_vmem [thread:$0]  %s13_s8, 4096, %s15_s10, [#allocation3], %s864_s11, %s864_s11, %s865_s12  }
   0x5   :  { %859 = dma.done.wait [#allocation3], 4096  }
   0x6   :  { %860 = vsyncadd [#allocation3], 4294963200  ;;  %v25_v0 = vld [vmem:[#allocation2] sm:$0xff]  ;;  %v26_v1 = vld [vmem:[#allocation2 + $0x8] sm:$0xff]  ;;  %vm352_vm0 = vcmask 1046528   ;;  %vm479_vm1 = vcmask 1045504  }
   0x7   :  { %v27_v2 = vld [vmem:[#allocation2 + $0x10] sm:$0xff]  ;;  %v883_v3 = vld [vmem:[#allocation2 + $0x20] sm:$0xff]  ;;  %v885_v4 = vld [vmem:[#allocation2 + $0x28] sm:$0xff]  ;;  %vm197_vm2 = vcmask 1041408   ;;  %s866_s0 = smov [#allocation5]   ;;  %s794_s16 = sshll.u32 %s1114_s1, 4  ;;  %s795_s16 = int_to_ptr.hbm [resolvable:$true] %s794_s16 }
   0x8   :  { %v57_v5 = vmul.f32 2.0, %v27_v2  ;;  %v28_v6 = vld [vmem:[#allocation2 + $0x18] sm:$0xff]  ;;  %v141_v7 = vsub.f32 %v25_v0, %v883_v3  ;;  %v142_v8 = vsub.f32 %v26_v1, %v885_v4  ;;  %v889_v10 = vld [vmem:[#allocation2 + $0x30] sm:$0xff]  ;;  %v59_v12 = vmul.f32 2.0, %v883_v3  ;;  %v905_v53 = vld [vmem:[#allocation2 + $0x40] sm:$0xff]  ;;  %s792_s13 = sshll.u32 %s866_s0, 4  ;;  %s793_s13 = int_to_ptr.vmem [resolvable:$true] %s792_s13 }
   0x9   :  { %v58_v9 = vmul.f32 2.0, %v28_v6  ;;  %v891_v11 = vld [vmem:[#allocation2 + $0x38] sm:$0xff]  ;;  %v143_v14 = vsub.f32 %v27_v2, %v889_v10  ;;  %v60_v16 = vmul.f32 2.0, %v885_v4  ;;  %v908_v58 = vld [vmem:[#allocation2 + $0x48] sm:$0xff]  ;;  %v61_v62 = vmul.f32 2.0, %v889_v10 }
   0xa   :  { %v85_v13 = vadd.f32 %v57_v5, %v25_v0  ;;  %v144_v15 = vsub.f32 %v28_v6, %v891_v11  ;;  %v296_v17 = vmul.f32 2.0, %v141_v7  ;;  %v297_v18 = vmul.f32 2.0, %v142_v8 }
   0xb   :  { %v480_v19 = vrot.slane %v141_v7, 2  ;;  %v481_v20 = vrot.slane %v142_v8, 2  ;;  %v86_v22 = vadd.f32 %v58_v9, %v26_v1  ;;  %v87_v23 = vadd.f32 %v59_v12, %v27_v2 }
   0xc   :  { %v113_v21 = vadd.f32 %v85_v13, %v883_v3  ;;  %v298_v24 = vmul.f32 2.0, %v143_v14  ;;  %v353_v25 = vrot.slane %v296_v17, 1  ;;  %v354_v26 = vrot.slane %v297_v18, 1 }
   0xd   :  { %v482_v27 = vsel %vm479_vm1, %v480_v19, %v481_v20  ;;  %v299_v28 = vmul.f32 2.0, %v144_v15  ;;  %v114_v30 = vadd.f32 %v86_v22, %v885_v4  ;;  %v115_v31 = vadd.f32 %v87_v23, %v889_v10 }
   0xe   :  { %v198_v29 = vrot.slane %v113_v21, 6  ;;  %v356_v32 = vrot.slane %v298_v24, 1  ;;  %v355_v33 = vsel %vm352_vm0, %v353_v25, %v354_v26  ;;  %v424_v34 = vadd.f32 %v354_v26, %v142_v8  ;;  %v920_v26 = vld [vmem:[#allocation2 + $0x50] sm:$0xff] }
   0xf   :  { %v357_v35 = vrot.slane %v299_v28, 1  ;;  %v483_v36 = vrot.slane %v143_v14, 2  ;;  %v423_v38 = vadd.f32 %v355_v33, %v141_v7  ;;  %v199_v39 = vrot.slane %v114_v30, 6 }
  0x10   :  { %v268_v37 = vsub.f32 %v113_v21, %v198_v29  ;;  %v201_v40 = vrot.slane %v115_v31, 6  ;;  %v551_v41 = vadd.f32 %v481_v20, %v424_v34  ;;  %v484_v43 = vrot.slane %v144_v15, 2 }
  0x11   :  { %v358_v42 = vsel %vm352_vm0, %v356_v32, %v357_v35  ;;  %v88_v44 = vadd.f32 %v60_v16, %v28_v6  ;;  %v550_v45 = vadd.f32 %v482_v27, %v423_v38  ;;  %v200_v47 = vsel %vm197_vm2, %v198_v29, %v199_v39 }
  0x12   :  { %v578_v46 = vand.u32 2147483647, %v268_v37  ;;  %v270_v48 = vsub.f32 %v115_v31, %v201_v40  ;;  %v269_v49 = vsub.f32 %v114_v30, %v200_v47  ;;  %v607_v50 = vand.u32 2147483647, %v551_v41  ;;  %v924_v31 = vld [vmem:[#allocation2 + $0x58] sm:$0xff] }
  0x13   :  { %v425_v51 = vadd.f32 %v358_v42, %v143_v14  ;;  %v485_v52 = vsel %vm479_vm1, %v483_v36, %v484_v43  ;;  %v606_v54 = vand.u32 2147483647, %v550_v45  ;;  %v116_v56 = vadd.f32 %v88_v44, %v891_v11 }
  0x14   :  { %v580_v55 = vand.u32 2147483647, %v270_v48  ;;  %v426_v57 = vadd.f32 %v357_v35, %v144_v15  ;;  %v579_v59 = vand.u32 2147483647, %v269_v49  ;;  %v663_v60 = vrot.slane %v607_v50, 6 }
  0x15   :  { %v552_v61 = vadd.f32 %v485_v52, %v425_v51  ;;  %v662_v63 = vrot.slane %v606_v54, 6  ;;  %v202_v0 = vrot.slane %v116_v56, 6  ;;  %v145_v2 = vsub.f32 %v883_v3, %v905_v53 }
  0x16   :  { %v553_v1 = vadd.f32 %v484_v43, %v426_v57  ;;  %v89_v6 = vadd.f32 %v61_v62, %v883_v3  ;;  %v146_v7 = vsub.f32 %v885_v4, %v908_v58  ;;  %v62_v8 = vmul.f32 2.0, %v891_v11 }
  0x17   :  { %v608_v5 = vand.u32 2147483647, %v552_v61  ;;  %v732_v9 = vadd.f32 %v662_v63, %v578_v46  ;;  %v664_v12 = vsel %vm197_vm2, %v662_v63, %v663_v60  ;;  %v203_v13 = vsel %vm197_vm2, %v201_v40, %v202_v0  ;;  %v940_v63 = vld [vmem:[#allocation2 + $0x60] sm:$0xff] }
  0x18   :  { %v609_v14 = vand.u32 2147483647, %v553_v1  ;;  %v733_v15 = vadd.f32 %v664_v12, %v579_v59  ;;  %v271_v17 = vsub.f32 %v116_v56, %v203_v13  ;;  %v117_v18 = vadd.f32 %v89_v6, %v905_v53  ;;  %v945_v12 = vld [vmem:[#allocation2 + $0x68] sm:$0xff] }
  0x19   :  { %v665_v16 = vrot.slane %v608_v5, 6  ;;  %760 = vst [vmem:[#allocation5 - $0x2] sm:$0xfc] %v732_v9  ;;  %v300_v20 = vmul.f32 2.0, %v145_v2  ;;  %v301_v3 = vmul.f32 2.0, %v146_v7  ;;  %v486_v21 = vrot.slane %v145_v2, 2 }
  0x1a   :  { %v666_v19 = vrot.slane %v609_v14, 6  ;;  %761 = vst [vmem:[#allocation5 + $0x6] sm:$0xff] %v733_v15  ;;  %v581_v23 = vand.u32 2147483647, %v271_v17  ;;  %v204_v24 = vrot.slane %v117_v18, 6  ;;  %v487_v25 = vrot.slane %v146_v7, 2 }
  0x1b   :  { %v734_v22 = vadd.f32 %v665_v16, %v580_v55  ;;  %v359_v28 = vrot.slane %v300_v20, 1  ;;  %v360_v29 = vrot.slane %v301_v3, 1  ;;  %v90_v30 = vadd.f32 %v62_v8, %v885_v4 }
  0x1c   :  { %v667_v27 = vsel %vm197_vm2, %v665_v16, %v666_v19  ;;  %v272_v33 = vsub.f32 %v117_v18, %v204_v24  ;;  %v488_v34 = vsel %vm479_vm1, %v486_v21, %v487_v25  ;;  %v63_v35 = vmul.f32 2.0, %v905_v53 }
  0x1d   :  { %762 = vst [vmem:[#allocation5 + $0xe] sm:$0xfc] %v734_v22  ;;  %v735_v32 = vadd.f32 %v667_v27, %v581_v23  ;;  %v361_v36 = vsel %vm352_vm0, %v359_v28, %v360_v29  ;;  %v118_v37 = vadd.f32 %v90_v30, %v908_v58  ;;  %v428_v38 = vadd.f32 %v360_v29, %v146_v7 }
  0x1e   :  { %v147_v39 = vsub.f32 %v889_v10, %v920_v26  ;;  %v427_v40 = vadd.f32 %v361_v36, %v145_v2  ;;  %v582_v4 = vand.u32 2147483647, %v272_v33  ;;  %v91_v41 = vadd.f32 %v63_v35, %v889_v10 }
  0x1f   :  { %763 = vst [vmem:[#allocation5 + $0x16] sm:$0xff] %v735_v32  ;;  %v148_v42 = vsub.f32 %v891_v11, %v924_v31  ;;  %v205_v43 = vrot.slane %v118_v37, 6  ;;  %v555_v44 = vadd.f32 %v487_v25, %v428_v38  ;;  %v64_v55 = vmul.f32 2.0, %v908_v58 }
  0x20   :  { %v302_v45 = vmul.f32 2.0, %v147_v39  ;;  %v489_v46 = vrot.slane %v147_v39, 2  ;;  %v554_v47 = vadd.f32 %v488_v34, %v427_v40  ;;  %v119_v48 = vadd.f32 %v91_v41, %v920_v26  ;;  %v957_v40 = vld [vmem:[#allocation2 + $0x70] sm:$0xff] }
  0x21   :  { %v303_v49 = vmul.f32 2.0, %v148_v42  ;;  %v490_v50 = vrot.slane %v148_v42, 2  ;;  %v206_v51 = vsel %vm197_vm2, %v204_v24, %v205_v43  ;;  %v611_v52 = vand.u32 2147483647, %v555_v44 }
  0x22   :  { %v362_v54 = vrot.slane %v302_v45, 1  ;;  %v610_v56 = vand.u32 2147483647, %v554_v47  ;;  %v273_v10 = vsub.f32 %v118_v37, %v206_v51  ;;  %v207_v57 = vrot.slane %v119_v48, 6  ;;  %v963_v45 = vld [vmem:[#allocation2 + $0x78] sm:$0xff] }
  0x23   :  { %v363_v59 = vrot.slane %v303_v49, 1  ;;  %v669_v60 = vrot.slane %v611_v52, 6  ;;  %v491_v61 = vsel %vm479_vm1, %v489_v46, %v490_v50  ;;  %v92_v62 = vadd.f32 %v64_v55, %v891_v11 }
  0x24   :  { %v65_v0 = vmul.f32 2.0, %v920_v26  ;;  %v668_v1 = vrot.slane %v610_v56, 6  ;;  %v583_v2 = vand.u32 2147483647, %v273_v10  ;;  %v274_v5 = vsub.f32 %v119_v48, %v207_v57 }
  0x25   :  { %v364_v6 = vsel %vm352_vm0, %v362_v54, %v363_v59  ;;  %v120_v8 = vadd.f32 %v92_v62, %v924_v31  ;;  %v430_v9 = vadd.f32 %v363_v59, %v148_v42  ;;  %v149_v16 = vsub.f32 %v905_v53, %v940_v63 }
  0x26   :  { %v429_v7 = vadd.f32 %v364_v6, %v147_v39  ;;  %v93_v13 = vadd.f32 %v65_v0, %v905_v53  ;;  %v736_v14 = vadd.f32 %v668_v1, %v582_v4  ;;  %v670_v11 = vsel %vm197_vm2, %v668_v1, %v669_v60 }
  0x27   :  { %v584_v15 = vand.u32 2147483647, %v274_v5  ;;  %v737_v17 = vadd.f32 %v670_v11, %v583_v2  ;;  %v208_v19 = vrot.slane %v120_v8, 6  ;;  %v557_v20 = vadd.f32 %v490_v50, %v430_v9 }
  0x28   :  { %v556_v18 = vadd.f32 %v491_v61, %v429_v7  ;;  %764 = vst [vmem:[#allocation5 + $0x1e] sm:$0xfc] %v736_v14  ;;  %v121_v3 = vadd.f32 %v93_v13, %v940_v63  ;;  %v150_v21 = vsub.f32 %v908_v58, %v945_v12  ;;  %v304_v22 = vmul.f32 2.0, %v149_v16 }
  0x29   :  { %v492_v23 = vrot.slane %v149_v16, 2  ;;  %765 = vst [vmem:[#allocation5 + $0x26] sm:$0xff] %v737_v17  ;;  %v209_v25 = vsel %vm197_vm2, %v207_v57, %v208_v19  ;;  %v613_v27 = vand.u32 2147483647, %v557_v20  ;;  %v66_v28 = vmul.f32 2.0, %v924_v31 }
  0x2a   :  { %v612_v24 = vand.u32 2147483647, %v556_v18  ;;  %v275_v53 = vsub.f32 %v120_v8, %v209_v25  ;;  %v210_v29 = vrot.slane %v121_v3, 6  ;;  %v305_v30 = vmul.f32 2.0, %v150_v21  ;;  %v975_v8 = vld [vmem:[#allocation2 + $0x80] sm:$0xff] }
  0x2b   :  { %v365_v32 = vrot.slane %v304_v22, 1  ;;  %v672_v34 = vrot.slane %v613_v27, 6  ;;  %v493_v35 = vrot.slane %v150_v21, 2  ;;  %v94_v36 = vadd.f32 %v66_v28, %v908_v58 }
  0x2c   :  { %v671_v33 = vrot.slane %v612_v24, 6  ;;  %v585_v37 = vand.u32 2147483647, %v275_v53  ;;  %v276_v38 = vsub.f32 %v121_v3, %v210_v29  ;;  %v366_v39 = vrot.slane %v305_v30, 1 }
  0x2d   :  { %v67_v4 = vmul.f32 2.0, %v940_v63  ;;  %v494_v43 = vsel %vm479_vm1, %v492_v23, %v493_v35  ;;  %v122_v44 = vadd.f32 %v94_v36, %v945_v12  ;;  %v151_v52 = vsub.f32 %v920_v26, %v957_v40 }
  0x2e   :  { %v738_v41 = vadd.f32 %v671_v33, %v584_v15  ;;  %v673_v42 = vsel %vm197_vm2, %v671_v33, %v672_v34  ;;  %v367_v47 = vsel %vm352_vm0, %v365_v32, %v366_v39  ;;  %v586_v58 = vand.u32 2147483647, %v276_v38 }
  0x2f   :  { %v739_v46 = vadd.f32 %v673_v42, %v585_v37  ;;  %v432_v48 = vadd.f32 %v366_v39, %v150_v21  ;;  %v431_v49 = vadd.f32 %v367_v47, %v149_v16  ;;  %v211_v50 = vrot.slane %v122_v44, 6  ;;  %v982_v21 = vld [vmem:[#allocation2 + $0x88] sm:$0xff]  ;;  %v992_v42 = vld [vmem:[#allocation2 + $0x90] sm:$0xff] }
  0x30   :  { %766 = vst [vmem:[#allocation5 + $0x2e] sm:$0xfc] %v738_v41  ;;  %v95_v51 = vadd.f32 %v67_v4, %v920_v26  ;;  %v152_v55 = vsub.f32 %v924_v31, %v963_v45  ;;  %v68_v56 = vmul.f32 2.0, %v945_v12  ;;  %v69_v10 = vmul.f32 2.0, %v957_v40 }
  0x31   :  { %767 = vst [vmem:[#allocation5 + $0x36] sm:$0xff] %v739_v46  ;;  %v559_v54 = vadd.f32 %v493_v35, %v432_v48  ;;  %v558_v57 = vadd.f32 %v494_v43, %v431_v49  ;;  %v212_v59 = vsel %vm197_vm2, %v210_v29, %v211_v50  ;;  %v306_v61 = vmul.f32 2.0, %v151_v52 }
  0x32   :  { %v123_v60 = vadd.f32 %v95_v51, %v957_v40  ;;  %v277_v62 = vsub.f32 %v122_v44, %v212_v59  ;;  %v307_v1 = vmul.f32 2.0, %v152_v55  ;;  %v495_v2 = vrot.slane %v151_v52, 2 }
  0x33   :  { %v615_v0 = vand.u32 2147483647, %v559_v54  ;;  %v614_v26 = vand.u32 2147483647, %v558_v57  ;;  %v368_v6 = vrot.slane %v306_v61, 1  ;;  %v496_v7 = vrot.slane %v152_v55, 2 }
  0x34   :  { %v213_v5 = vrot.slane %v123_v60, 6  ;;  %v587_v9 = vand.u32 2147483647, %v277_v62  ;;  %v369_v14 = vrot.slane %v307_v1, 1  ;;  %v96_v11 = vadd.f32 %v68_v56, %v924_v31 }
  0x35   :  { %v675_v13 = vrot.slane %v615_v0, 6  ;;  %v674_v15 = vrot.slane %v614_v26, 6  ;;  %v497_v17 = vsel %vm479_vm1, %v495_v2, %v496_v7  ;;  %v97_v18 = vadd.f32 %v69_v10, %v940_v63 }
  0x36   :  { %v278_v16 = vsub.f32 %v123_v60, %v213_v5  ;;  %v370_v19 = vsel %vm352_vm0, %v368_v6, %v369_v14  ;;  %v124_v20 = vadd.f32 %v96_v11, %v963_v45  ;;  %v434_v3 = vadd.f32 %v369_v14, %v152_v55  ;;  %v998_v55 = vld [vmem:[#allocation2 + $0x98] sm:$0xff] }
  0x37   :  { %v153_v22 = vsub.f32 %v940_v63, %v975_v8  ;;  %v740_v23 = vadd.f32 %v674_v15, %v586_v58  ;;  %v676_v24 = vsel %vm197_vm2, %v674_v15, %v675_v13  ;;  %v433_v31 = vadd.f32 %v370_v19, %v151_v52 }
  0x38   :  { %v588_v25 = vand.u32 2147483647, %v278_v16  ;;  %v741_v27 = vadd.f32 %v676_v24, %v587_v9  ;;  %v214_v28 = vrot.slane %v124_v20, 6  ;;  %v561_v53 = vadd.f32 %v496_v7, %v434_v3 }
  0x39   :  { %v125_v29 = vadd.f32 %v97_v18, %v975_v8  ;;  %768 = vst [vmem:[#allocation5 + $0x3e] sm:$0xfc] %v740_v23  ;;  %v560_v30 = vadd.f32 %v497_v17, %v433_v31  ;;  %v154_v32 = vsub.f32 %v945_v12, %v982_v21  ;;  %v308_v33 = vmul.f32 2.0, %v153_v22 }
  0x3a   :  { %v498_v34 = vrot.slane %v153_v22, 2  ;;  %769 = vst [vmem:[#allocation5 + $0x46] sm:$0xff] %v741_v27  ;;  %v215_v63 = vsel %vm197_vm2, %v213_v5, %v214_v28  ;;  %v617_v35 = vand.u32 2147483647, %v561_v53  ;;  %v70_v37 = vmul.f32 2.0, %v963_v45 }
  0x3b   :  { %v216_v36 = vrot.slane %v125_v29, 6  ;;  %v616_v38 = vand.u32 2147483647, %v560_v30  ;;  %v279_v39 = vsub.f32 %v124_v20, %v215_v63  ;;  %v309_v4 = vmul.f32 2.0, %v154_v32  ;;  %v1011_v20 = vld [vmem:[#allocation2 + $0xa0] sm:$0xff]  ;;  %v1017_v30 = vld [vmem:[#allocation2 + $0xa8] sm:$0xff] }
  0x3c   :  { %v371_v41 = vrot.slane %v308_v33, 1  ;;  %v678_v43 = vrot.slane %v617_v35, 6  ;;  %v499_v46 = vrot.slane %v154_v32, 2  ;;  %v98_v47 = vadd.f32 %v70_v37, %v945_v12 }
  0x3d   :  { %v280_v44 = vsub.f32 %v125_v29, %v216_v36  ;;  %v677_v58 = vrot.slane %v616_v38, 6  ;;  %v589_v48 = vand.u32 2147483647, %v279_v39  ;;  %v372_v49 = vrot.slane %v309_v4, 1 }
  0x3e   :  { %v71_v50 = vmul.f32 2.0, %v975_v8  ;;  %v500_v51 = vsel %vm479_vm1, %v498_v34, %v499_v46  ;;  %v126_v54 = vadd.f32 %v98_v47, %v982_v21  ;;  %v155_v56 = vsub.f32 %v957_v40, %v992_v42 }
  0x3f   :  { %v590_v52 = vand.u32 2147483647, %v280_v44  ;;  %v742_v10 = vadd.f32 %v677_v58, %v588_v25  ;;  %v679_v57 = vsel %vm197_vm2, %v677_v58, %v678_v43  ;;  %v373_v12 = vsel %vm352_vm0, %v371_v41, %v372_v49 }
  0x40   :  { %v436_v59 = vadd.f32 %v372_v49, %v154_v32  ;;  %v743_v60 = vadd.f32 %v679_v57, %v589_v48  ;;  %v435_v61 = vadd.f32 %v373_v12, %v153_v22  ;;  %v217_v62 = vrot.slane %v126_v54, 6 }
  0x41   :  { %v99_v0 = vadd.f32 %v71_v50, %v957_v40  ;;  %770 = vst [vmem:[#allocation5 + $0x4e] sm:$0xfc] %v742_v10  ;;  %v156_v2 = vsub.f32 %v963_v45, %v998_v55  ;;  %v310_v26 = vmul.f32 2.0, %v155_v56  ;;  %v501_v5 = vrot.slane %v155_v56, 2 }
  0x42   :  { %v563_v1 = vadd.f32 %v499_v46, %v436_v59  ;;  %771 = vst [vmem:[#allocation5 + $0x56] sm:$0xff] %v743_v60  ;;  %v562_v6 = vadd.f32 %v500_v51, %v435_v61  ;;  %v218_v7 = vsel %vm197_vm2, %v216_v36, %v217_v62  ;;  %v72_v13 = vmul.f32 2.0, %v982_v21 }
  0x43   :  { %v127_v9 = vadd.f32 %v99_v0, %v992_v42  ;;  %v281_v14 = vsub.f32 %v126_v54, %v218_v7  ;;  %v311_v15 = vmul.f32 2.0, %v156_v2  ;;  %v374_v16 = vrot.slane %v310_v26, 1 }
  0x44   :  { %v619_v11 = vand.u32 2147483647, %v563_v1  ;;  %v618_v40 = vand.u32 2147483647, %v562_v6  ;;  %v502_v18 = vrot.slane %v156_v2, 2  ;;  %v100_v19 = vadd.f32 %v72_v13, %v963_v45 }
  0x45   :  { %v219_v17 = vrot.slane %v127_v9, 6  ;;  %v591_v3 = vand.u32 2147483647, %v281_v14  ;;  %v375_v23 = vrot.slane %v311_v15, 1  ;;  %v73_v24 = vmul.f32 2.0, %v992_v42 }
  0x46   :  { %v681_v22 = vrot.slane %v619_v11, 6  ;;  %v680_v31 = vrot.slane %v618_v40, 6  ;;  %v503_v27 = vsel %vm479_vm1, %v501_v5, %v502_v18  ;;  %v128_v28 = vadd.f32 %v100_v19, %v998_v55 }
  0x47   :  { %v282_v25 = vsub.f32 %v127_v9, %v219_v17  ;;  %v376_v53 = vsel %vm352_vm0, %v374_v16, %v375_v23  ;;  %v438_v29 = vadd.f32 %v375_v23, %v156_v2  ;;  %v101_v45 = vadd.f32 %v73_v24, %v975_v8  ;;  %v1034_v2 = vld [vmem:[#allocation2 + $0xb8] sm:$0xff] }
  0x48   :  { %v157_v32 = vsub.f32 %v975_v8, %v1011_v20  ;;  %v744_v33 = vadd.f32 %v680_v31, %v590_v52  ;;  %v682_v34 = vsel %vm197_vm2, %v680_v31, %v681_v22  ;;  %v437_v63 = vadd.f32 %v376_v53, %v155_v56  ;;  %v1028_v52 = vld [vmem:[#allocation2 + $0xb0] sm:$0xff] }
  0x49   :  { %v592_v35 = vand.u32 2147483647, %v282_v25  ;;  %v745_v36 = vadd.f32 %v682_v34, %v591_v3  ;;  %v220_v37 = vrot.slane %v128_v28, 6  ;;  %v565_v38 = vadd.f32 %v502_v18, %v438_v29  ;;  %v1047_v29 = vld [vmem:[#allocation2 + $0xc0] sm:$0xff] }
  0x4a   :  { %v129_v39 = vadd.f32 %v101_v45, %v1011_v20  ;;  %772 = vst [vmem:[#allocation5 + $0x5e] sm:$0xfc] %v744_v33  ;;  %v564_v4 = vadd.f32 %v503_v27, %v437_v63  ;;  %v158_v41 = vsub.f32 %v982_v21, %v1017_v30  ;;  %v312_v43 = vmul.f32 2.0, %v157_v32 }
  0x4b   :  { %v504_v44 = vrot.slane %v157_v32, 2  ;;  %773 = vst [vmem:[#allocation5 + $0x66] sm:$0xff] %v745_v36  ;;  %v221_v8 = vsel %vm197_vm2, %v219_v17, %v220_v37  ;;  %v621_v46 = vand.u32 2147483647, %v565_v38  ;;  %v74_v58 = vmul.f32 2.0, %v998_v55 }
  0x4c   :  { %v222_v47 = vrot.slane %v129_v39, 6  ;;  %v620_v48 = vand.u32 2147483647, %v564_v4  ;;  %v283_v49 = vsub.f32 %v128_v28, %v221_v8  ;;  %v313_v50 = vmul.f32 2.0, %v158_v41  ;;  %v1053_v4 = vld [vmem:[#allocation2 + $0xc8] sm:$0xff] }
  0x4d   :  { %v377_v51 = vrot.slane %v312_v43, 1  ;;  %v684_v54 = vrot.slane %v621_v46, 6  ;;  %v505_v10 = vrot.slane %v158_v41, 2  ;;  %v102_v57 = vadd.f32 %v74_v58, %v982_v21 }
  0x4e   :  { %v284_v56 = vsub.f32 %v129_v39, %v222_v47  ;;  %v683_v12 = vrot.slane %v620_v48, 6  ;;  %v593_v59 = vand.u32 2147483647, %v283_v49  ;;  %v378_v60 = vrot.slane %v313_v50, 1 }
  0x4f   :  { %v75_v61 = vmul.f32 2.0, %v1011_v20  ;;  %v506_v62 = vsel %vm479_vm1, %v504_v44, %v505_v10  ;;  %v130_v1 = vadd.f32 %v102_v57, %v1017_v30  ;;  %v159_v26 = vsub.f32 %v992_v42, %v1028_v52 }
  0x50   :  { %v594_v0 = vand.u32 2147483647, %v284_v56  ;;  %v746_v5 = vadd.f32 %v683_v12, %v592_v35  ;;  %v685_v6 = vsel %vm197_vm2, %v683_v12, %v684_v54  ;;  %v379_v21 = vsel %vm352_vm0, %v377_v51, %v378_v60 }
  0x51   :  { %v440_v7 = vadd.f32 %v378_v60, %v158_v41  ;;  %v747_v9 = vadd.f32 %v685_v6, %v593_v59  ;;  %v439_v13 = vadd.f32 %v379_v21, %v157_v32  ;;  %v223_v14 = vrot.slane %v130_v1, 6 }
  0x52   :  { %v103_v11 = vadd.f32 %v75_v61, %v992_v42  ;;  %774 = vst [vmem:[#allocation5 + $0x6e] sm:$0xfc] %v746_v5  ;;  %v160_v16 = vsub.f32 %v998_v55, %v1034_v2  ;;  %v314_v40 = vmul.f32 2.0, %v159_v26  ;;  %v507_v17 = vrot.slane %v159_v26, 2 }
  0x53   :  { %v567_v15 = vadd.f32 %v505_v10, %v440_v7  ;;  %775 = vst [vmem:[#allocation5 + $0x76] sm:$0xff] %v747_v9  ;;  %v566_v18 = vadd.f32 %v506_v62, %v439_v13  ;;  %v224_v19 = vsel %vm197_vm2, %v222_v47, %v223_v14  ;;  %v76_v22 = vmul.f32 2.0, %v1017_v30 }
  0x54   :  { %v131_v3 = vadd.f32 %v103_v11, %v1028_v52  ;;  %v285_v23 = vsub.f32 %v130_v1, %v224_v19  ;;  %v315_v31 = vmul.f32 2.0, %v160_v16  ;;  %v380_v25 = vrot.slane %v314_v40, 1 }
  0x55   :  { %v623_v24 = vand.u32 2147483647, %v567_v15  ;;  %v622_v42 = vand.u32 2147483647, %v566_v18  ;;  %v508_v28 = vrot.slane %v160_v16, 2  ;;  %v104_v53 = vadd.f32 %v76_v22, %v998_v55 }
  0x56   :  { %v225_v27 = vrot.slane %v131_v3, 6  ;;  %v595_v45 = vand.u32 2147483647, %v285_v23  ;;  %v381_v33 = vrot.slane %v315_v31, 1  ;;  %v77_v34 = vmul.f32 2.0, %v1028_v52 }
  0x57   :  { %v687_v32 = vrot.slane %v623_v24, 6  ;;  %v686_v63 = vrot.slane %v622_v42, 6  ;;  %v509_v36 = vsel %vm479_vm1, %v507_v17, %v508_v28  ;;  %v132_v37 = vadd.f32 %v104_v53, %v1034_v2 }
  0x58   :  { %v286_v35 = vsub.f32 %v131_v3, %v225_v27  ;;  %v382_v38 = vsel %vm352_vm0, %v380_v25, %v381_v33  ;;  %v442_v39 = vadd.f32 %v381_v33, %v160_v16  ;;  %v105_v55 = vadd.f32 %v77_v34, %v1011_v20  ;;  %v1070_v16 = vld [vmem:[#allocation2 + $0xd8] sm:$0xff] }
  0x59   :  { %v161_v41 = vsub.f32 %v1011_v20, %v1047_v29  ;;  %v748_v43 = vadd.f32 %v686_v63, %v594_v0  ;;  %v688_v44 = vsel %vm197_vm2, %v686_v63, %v687_v32  ;;  %v441_v8 = vadd.f32 %v382_v38, %v159_v26  ;;  %v1064_v0 = vld [vmem:[#allocation2 + $0xd0] sm:$0xff] }
  0x5a   :  { %v596_v46 = vand.u32 2147483647, %v286_v35  ;;  %v749_v47 = vadd.f32 %v688_v44, %v595_v45  ;;  %v226_v58 = vrot.slane %v132_v37, 6  ;;  %v569_v48 = vadd.f32 %v508_v28, %v442_v39  ;;  %v53_v39 = vld [vmem:[#allocation2 + $0xe0] sm:$0xff] }
  0x5b   :  { %v133_v49 = vadd.f32 %v105_v55, %v1047_v29  ;;  %776 = vst [vmem:[#allocation5 + $0x7e] sm:$0xfc] %v748_v43  ;;  %v568_v50 = vadd.f32 %v509_v36, %v441_v8  ;;  %v162_v51 = vsub.f32 %v1017_v30, %v1053_v4  ;;  %v316_v54 = vmul.f32 2.0, %v161_v41 }
  0x5c   :  { %v510_v56 = vrot.slane %v161_v41, 2  ;;  %777 = vst [vmem:[#allocation5 + $0x86] sm:$0xff] %v749_v47  ;;  %v227_v20 = vsel %vm197_vm2, %v225_v27, %v226_v58  ;;  %v625_v10 = vand.u32 2147483647, %v569_v48  ;;  %v78_v12 = vmul.f32 2.0, %v1034_v2 }
  0x5d   :  { %v228_v57 = vrot.slane %v133_v49, 6  ;;  %v624_v59 = vand.u32 2147483647, %v568_v50  ;;  %v287_v60 = vsub.f32 %v132_v37, %v227_v20  ;;  %v317_v61 = vmul.f32 2.0, %v162_v51  ;;  %v54_v50 = vld [vmem:[#allocation2 + $0xe8] sm:$0xff] }
  0x5e   :  { %v383_v62 = vrot.slane %v316_v54, 1  ;;  %v690_v1 = vrot.slane %v625_v10, 6  ;;  %v511_v5 = vrot.slane %v162_v51, 2  ;;  %v106_v6 = vadd.f32 %v78_v12, %v1017_v30 }
  0x5f   :  { %v288_v26 = vsub.f32 %v133_v49, %v228_v57  ;;  %v689_v21 = vrot.slane %v624_v59, 6  ;;  %v597_v7 = vand.u32 2147483647, %v287_v60  ;;  %v384_v9 = vrot.slane %v317_v61, 1 }
  0x60   :  { %v79_v13 = vmul.f32 2.0, %v1047_v29  ;;  %v512_v14 = vsel %vm479_vm1, %v510_v56, %v511_v5  ;;  %v134_v15 = vadd.f32 %v106_v6, %v1053_v4  ;;  %v163_v40 = vsub.f32 %v1028_v52, %v1064_v0 }
  0x61   :  { %v598_v11 = vand.u32 2147483647, %v288_v26  ;;  %v750_v17 = vadd.f32 %v689_v21, %v596_v46  ;;  %v691_v18 = vsel %vm197_vm2, %v689_v21, %v690_v1  ;;  %v385_v30 = vsel %vm352_vm0, %v383_v62, %v384_v9 }
  0x62   :  { %v444_v19 = vadd.f32 %v384_v9, %v162_v51  ;;  %v751_v3 = vadd.f32 %v691_v18, %v597_v7  ;;  %v443_v22 = vadd.f32 %v385_v30, %v161_v41  ;;  %v229_v23 = vrot.slane %v134_v15, 6 }
  0x63   :  { %v107_v24 = vadd.f32 %v79_v13, %v1028_v52  ;;  %778 = vst [vmem:[#allocation5 + $0x8e] sm:$0xfc] %v750_v17  ;;  %v164_v25 = vsub.f32 %v1034_v2, %v1070_v16  ;;  %v318_v42 = vmul.f32 2.0, %v163_v40  ;;  %v513_v27 = vrot.slane %v163_v40, 2 }
  0x64   :  { %v571_v31 = vadd.f32 %v511_v5, %v444_v19  ;;  %779 = vst [vmem:[#allocation5 + $0x96] sm:$0xff] %v751_v3  ;;  %v570_v28 = vadd.f32 %v512_v14, %v443_v22  ;;  %v230_v53 = vsel %vm197_vm2, %v228_v57, %v229_v23  ;;  %v80_v32 = vmul.f32 2.0, %v1053_v4 }
  0x65   :  { %v135_v45 = vadd.f32 %v107_v24, %v1064_v0  ;;  %v289_v33 = vsub.f32 %v134_v15, %v230_v53  ;;  %v319_v63 = vmul.f32 2.0, %v164_v25  ;;  %v386_v35 = vrot.slane %v318_v42, 1 }
  0x66   :  { %v627_v34 = vand.u32 2147483647, %v571_v31  ;;  %v626_v52 = vand.u32 2147483647, %v570_v28  ;;  %v514_v37 = vrot.slane %v164_v25, 2  ;;  %v108_v38 = vadd.f32 %v80_v32, %v1034_v2 }
  0x67   :  { %v231_v36 = vrot.slane %v135_v45, 6  ;;  %v599_v55 = vand.u32 2147483647, %v289_v33  ;;  %v387_v43 = vrot.slane %v319_v63, 1  ;;  %v81_v44 = vmul.f32 2.0, %v1064_v0 }
  0x68   :  { %v693_v41 = vrot.slane %v627_v34, 6  ;;  %v692_v8 = vrot.slane %v626_v52, 6  ;;  %v515_v47 = vsel %vm479_vm1, %v513_v27, %v514_v37  ;;  %v136_v58 = vadd.f32 %v108_v38, %v1070_v16 }
  0x69   :  { %v290_v46 = vsub.f32 %v135_v45, %v231_v36  ;;  %v388_v48 = vsel %vm352_vm0, %v386_v35, %v387_v43  ;;  %v446_v49 = vadd.f32 %v387_v43, %v164_v25  ;;  %v109_v51 = vadd.f32 %v81_v44, %v1047_v29  ;;  %v56_v25 = vld [vmem:[#allocation2 + $0xf8] sm:$0xff] }
  0x6a   :  { %v165_v2 = vsub.f32 %v1047_v29, %v53_v39  ;;  %v752_v54 = vadd.f32 %v692_v8, %v598_v11  ;;  %v694_v56 = vsel %vm197_vm2, %v692_v8, %v693_v41  ;;  %v445_v20 = vadd.f32 %v388_v48, %v163_v40  ;;  %v55_v11 = vld [vmem:[#allocation2 + $0xf0] sm:$0xff] }
  0x6b   :  { %v600_v10 = vand.u32 2147483647, %v290_v46  ;;  %v753_v57 = vadd.f32 %v694_v56, %v599_v55  ;;  %v232_v12 = vrot.slane %v136_v58, 6  ;;  %v573_v59 = vadd.f32 %v514_v37, %v446_v49 }
  0x6c   :  { %v137_v60 = vadd.f32 %v109_v51, %v53_v39  ;;  %780 = vst [vmem:[#allocation5 + $0x9e] sm:$0xfc] %v752_v54  ;;  %v572_v61 = vadd.f32 %v515_v47, %v445_v20  ;;  %v166_v62 = vsub.f32 %v1053_v4, %v54_v50  ;;  %v320_v1 = vmul.f32 2.0, %v165_v2 }
  0x6d   :  { %v516_v26 = vrot.slane %v165_v2, 2  ;;  %781 = vst [vmem:[#allocation5 + $0xa6] sm:$0xff] %v753_v57  ;;  %v233_v5 = vsel %vm197_vm2, %v231_v36, %v232_v12  ;;  %v629_v6 = vand.u32 2147483647, %v573_v59  ;;  %v82_v21 = vmul.f32 2.0, %v1070_v16 }
  0x6e   :  { %v234_v29 = vrot.slane %v137_v60, 6  ;;  %v628_v7 = vand.u32 2147483647, %v572_v61  ;;  %v291_v9 = vsub.f32 %v136_v58, %v233_v5  ;;  %v321_v13 = vmul.f32 2.0, %v166_v62 }
  0x6f   :  { %v389_v14 = vrot.slane %v320_v1, 1  ;;  %v696_v15 = vrot.slane %v629_v6, 6  ;;  %v517_v17 = vrot.slane %v166_v62, 2  ;;  %v110_v18 = vadd.f32 %v82_v21, %v1053_v4 }
  0x70   :  { %v292_v40 = vsub.f32 %v137_v60, %v234_v29  ;;  %v695_v30 = vrot.slane %v628_v7, 6  ;;  %v601_v19 = vand.u32 2147483647, %v291_v9  ;;  %v390_v3 = vrot.slane %v321_v13, 1 }
  0x71   :  { %v83_v22 = vmul.f32 2.0, %v53_v39  ;;  %v518_v23 = vsel %vm479_vm1, %v516_v26, %v517_v17  ;;  %v138_v31 = vadd.f32 %v110_v18, %v54_v50  ;;  %v167_v42 = vsub.f32 %v1064_v0, %v55_v11 }
  0x72   :  { %v602_v24 = vand.u32 2147483647, %v292_v40  ;;  %v754_v27 = vadd.f32 %v695_v30, %v600_v10  ;;  %v697_v28 = vsel %vm197_vm2, %v695_v30, %v696_v15  ;;  %v391_v53 = vsel %vm352_vm0, %v389_v14, %v390_v3 }
  0x73   :  { %v448_v45 = vadd.f32 %v390_v3, %v166_v62  ;;  %v755_v32 = vadd.f32 %v697_v28, %v601_v19  ;;  %v447_v33 = vadd.f32 %v391_v53, %v165_v2  ;;  %v235_v4 = vrot.slane %v138_v31, 6 }
  0x74   :  { %v111_v34 = vadd.f32 %v83_v22, %v1064_v0  ;;  %782 = vst [vmem:[#allocation5 + $0xae] sm:$0xfc] %v754_v27  ;;  %v168_v35 = vsub.f32 %v1070_v16, %v56_v25  ;;  %v322_v52 = vmul.f32 2.0, %v167_v42  ;;  %v519_v36 = vrot.slane %v167_v42, 2 }
  0x75   :  { %v575_v63 = vadd.f32 %v517_v17, %v448_v45  ;;  %783 = vst [vmem:[#allocation5 + $0xb6] sm:$0xff] %v755_v32  ;;  %v574_v37 = vadd.f32 %v518_v23, %v447_v33  ;;  %v236_v38 = vsel %vm197_vm2, %v234_v29, %v235_v4  ;;  %v84_v55 = vmul.f32 2.0, %v54_v50 }
  0x76   :  { %v139_v39 = vadd.f32 %v111_v34, %v55_v11  ;;  %v293_v41 = vsub.f32 %v138_v31, %v236_v38  ;;  %v323_v44 = vmul.f32 2.0, %v168_v35  ;;  %v392_v8 = vrot.slane %v322_v52, 1 }
  0x77   :  { %v631_v43 = vand.u32 2147483647, %v575_v63  ;;  %v630_v46 = vand.u32 2147483647, %v574_v37  ;;  %v520_v58 = vrot.slane %v168_v35, 2  ;;  %v112_v0 = vadd.f32 %v84_v55, %v1070_v16 }
  0x78   :  { %v237_v47 = vrot.slane %v139_v39, 6  ;;  %v603_v48 = vand.u32 2147483647, %v293_v41  ;;  %v393_v51 = vrot.slane %v323_v44, 1 }
  0x79   :  { %v699_v49 = vrot.slane %v631_v43, 6  ;;  %v698_v2 = vrot.slane %v630_v46, 6  ;;  %v140_v54 = vadd.f32 %v112_v0, %v56_v25  ;;  %v521_v20 = vsel %vm479_vm1, %v519_v36, %v520_v58 }
  0x7a   :  { %v394_v56 = vsel %vm352_vm0, %v392_v8, %v393_v51  ;;  %v450_v10 = vadd.f32 %v393_v51, %v168_v35  ;;  %v294_v12 = vsub.f32 %v139_v39, %v237_v47 }
  0x7b   :  { %v756_v50 = vadd.f32 %v698_v2, %v602_v24  ;;  %v700_v57 = vsel %vm197_vm2, %v698_v2, %v699_v49  ;;  %v449_v59 = vadd.f32 %v394_v56, %v167_v42  ;;  %v238_v61 = vrot.slane %v140_v54, 6 }
  0x7c   :  { %v757_v60 = vadd.f32 %v700_v57, %v603_v48  ;;  %v577_v62 = vadd.f32 %v520_v58, %v450_v10  ;;  %v604_v5 = vand.u32 2147483647, %v294_v12 }
  0x7d   :  { %784 = vst [vmem:[#allocation5 + $0xbe] sm:$0xfc] %v756_v50  ;;  %v576_v16 = vadd.f32 %v521_v20, %v449_v59  ;;  %v239_v1 = vsel %vm197_vm2, %v237_v47, %v238_v61 }
  0x7e   :  { %785 = vst [vmem:[#allocation5 + $0xc6] sm:$0xff] %v757_v60  ;;  %v633_v26 = vand.u32 2147483647, %v577_v62  ;;  %v295_v29 = vsub.f32 %v140_v54, %v239_v1 }
  0x7f   :  { %v632_v6 = vand.u32 2147483647, %v576_v16 }
  0x80   :  { %v702_v21 = vrot.slane %v633_v26, 6  ;;  %v605_v9 = vand.u32 2147483647, %v295_v29 }
  0x81   :  { %v701_v7 = vrot.slane %v632_v6, 6 }
  0x83   :  { %v758_v13 = vadd.f32 %v701_v7, %v604_v5  ;;  %v703_v14 = vsel %vm197_vm2, %v701_v7, %v702_v21 }
  0x84   :  { %v759_v11 = vadd.f32 %v703_v14, %v605_v9 }
  0x85   :  { %786 = vst [vmem:[#allocation5 + $0xce] sm:$0xfc] %v758_v13 }
  0x86   :  { %787 = vst [vmem:[#allocation5 + $0xd6] sm:$0xff] %v759_v11 }
  0x87   :  { %800 = dma.vmem_to_hbm [thread:$0]  %s793_s13, 3584, %s795_s16, [#allocation4], %s864_s11, %s864_s11, %s865_s12  }
  0x88   :  { %861 = dma.done.wait [#allocation4], 3584  }
  0x89   :  { %862 = vsyncadd [#allocation4], 4294963712 }
  0x8a   :  { %805 = vsyncpa [#allocation3], 1 }
  0x8b   :  { %806 = vsyncpa [#allocation4], 1 }

</bundles_post_ra>
